<compile_context>
chip_gen: v7x
topology: tpu7x:2x2x1
jax: 0.10.0
libtpu: 0.0.40
codegen_flags: <defaults>
</compile_context>

<pallas_src>
import functools

import jax
import jax.numpy as jnp
from jax.experimental import pallas as pl
from jax.experimental.pallas import tpu as pltpu


# ----------------------------------------------------------------------------
# Pallas kernel: identity pass-through (the only tensor "compute" in forward).
# ----------------------------------------------------------------------------
def _identity_copy_kernel(x_ref, o_ref):
    o_ref[...] = x_ref[...]


# Sublane packing multiples by itemsize (f32:8, bf16:16, int8/fp8:32).
_SUBLANE_BY_ITEMSIZE = {8: 8, 4: 8, 2: 16, 1: 32}

# ~4 MiB per block: (in + out) x 2-deep buffering = 16 MiB, comfortably under
# the explicit 32 MiB VMEM limit below on every generation (v5e/v6e/v7x).
_BLOCK_BYTE_BUDGET = 4 * 1024 * 1024
_VMEM_LIMIT_BYTES = 32 * 1024 * 1024

# Slabs larger than this are split into >= 2 grid steps so v7x's two
# TensorCores both stream (grid axis is "parallel").
_MIN_SPLIT_BYTES = 8 * 1024 * 1024

_COL_CANDIDATES = (8192, 4096, 2048, 1024, 512, 256, 128)


def _choose_tiling(total_elems: int, itemsize: int):
    """Pick (rows, cols, tile_rows) for a lane-dense identity copy."""
    sub = _SUBLANE_BY_ITEMSIZE.get(itemsize, 8)

    # Prefer the widest lane dimension that also makes rows a multiple of the
    # sublane pack (full (8,128)-aligned tiles -> unmasked stores); otherwise
    # fall back to the widest lane dimension that divides the element count.
    cols = None
    fallback_cols = None
    for c in _COL_CANDIDATES:
        if total_elems % c:
            continue
        if fallback_cols is None:
            fallback_cols = c
        if (total_elems // c) % sub == 0:
            cols = c
            break
    if cols is None:
        cols = fallback_cols
    if cols is None:
        # TODO(synk): masked tail handling for element counts not divisible by
        # 128; the plain identity return upstream is semantically exact anyway.
        return None
    rows = total_elems // cols

    # Largest sublane-aligned tile under the per-block byte budget; the grid
    # uses cdiv with a masked partial last block, so no divisor search needed.
    max_rows = max(sub, (_BLOCK_BYTE_BUDGET // (cols * itemsize)) // sub * sub)
    tile_rows = min(rows, max_rows)

    # v7x megacore: force >= 2 parallel blocks for large slabs so both TCs
    # stream halves concurrently (harmless on 1-TC v5e/v6e).
    total_bytes = total_elems * itemsize
    if total_bytes > _MIN_SPLIT_BYTES and tile_rows >= rows:
        half = (rows + 1) // 2
        tile_rows = min(rows, max(sub, (half + sub - 1) // sub * sub))

    # Tile shape legality: a partial last tile is fine (cdiv grid), but a tile
    # smaller than the full rows extent must be a sublane multiple.
    if tile_rows < rows and tile_rows % sub:
        tile_rows = max(sub, (tile_rows // sub) * sub)

    return rows, cols, tile_rows


@functools.lru_cache(maxsize=None)
def _build_identity_call(rows: int, cols: int, tile_rows: int, dtype_name: str):
    dtype = jnp.dtype(dtype_name)
    n_blocks = pl.cdiv(rows, tile_rows)
    call = pl.pallas_call(
        _identity_copy_kernel,
        out_shape=jax.ShapeDtypeStruct((rows, cols), dtype),
        grid_spec=pltpu.PrefetchScalarGridSpec(
            num_scalar_prefetch=0,
            grid=(n_blocks,),
            in_specs=[pl.BlockSpec((tile_rows, cols), lambda i: (i, 0))],
            out_specs=pl.BlockSpec((tile_rows, cols), lambda i: (i, 0)),
        ),
        compiler_params=pltpu.CompilerParams(
            dimension_semantics=("parallel",),   # shards blocks across TCs on v7x
            vmem_limit_bytes=_VMEM_LIMIT_BYTES,  # explicit; safe on v5e/v6e/v7x
        ),
    )
    return jax.jit(call)


def pallas_identity_copy(tensor: jax.Array) -> jax.Array:
    """Materialize `tensor` through a lane-dense Pallas identity copy."""
    orig_shape = tensor.shape
    dt = jnp.dtype(tensor.dtype)
    tiling = _choose_tiling(tensor.size, dt.itemsize)
    if tiling is None:
        return tensor  # exact: identity without a kernel
    rows, cols, tile_rows = tiling
    x2d = tensor.reshape(rows, cols)  # lane-dense slab (metadata-only reshape)
    call = _build_identity_call(rows, cols, tile_rows, dt.name)
    return call(x2d).reshape(orig_shape)


# ----------------------------------------------------------------------------
# MyModule equivalent
# ----------------------------------------------------------------------------
class MyModuleJax:
    def __init__(self, first_arg, first_kwarg=-1):
        # _PARAM_VAL = torch.nn.Parameter(torch.ones(1)); unused in forward.
        self.param1 = jnp.ones((1,), dtype=jnp.float32)

    def forward(self, tensor: jax.Array, number: int, word: str = "default",
                *, materialize: bool = False):
        # forward is a pure identity on the tensor. Fastest (and exact) is to
        # return the input directly; `materialize=True` routes through the
        # Pallas copy when a freshly materialized buffer is required.
        out = pallas_identity_copy(tensor) if materialize else tensor
        return (word, number, out)


if __name__ == "__main__":
    key = jax.random.PRNGKey(0)
    # Small NCHW tensor consistent with a generic Tensor argument.
    x = jax.random.normal(key, (2, 4, 16, 16), dtype=jnp.float32)

    module = MyModuleJax(first_arg=1, first_kwarg=2)

    # Default (recommended) path: pure identity bypass, no kernel.
    word, number, out_bypass = module.forward(x, number=3, word="hello")
    assert word == "hello" and number == 3
    assert out_bypass.shape == x.shape and out_bypass.dtype == x.dtype

    # Materialized path: run the Pallas identity kernel once on TPU.
    word, number, out = module.forward(x, number=3, word="hello", materialize=True)
    out = jax.block_until_ready(out)

    assert word == "hello"
    assert number == 3
    assert out.shape == x.shape and out.dtype == x.dtype
    assert bool(jnp.array_equal(out, x))
    assert bool(jnp.array_equal(out_bypass, x))
    print("KERNEL_OK")
</pallas_src>

<mosaic_0001>
module attributes {stable_mosaic.version = 11 : i64} {
  func.func @_identity_copy_kernel(%arg0: i32, %arg1: memref<8x256xf32, #tpu.memory_space<vmem>>, %arg2: memref<8x256xf32, #tpu.memory_space<vmem>>) attributes {dimension_semantics = [#tpu.dimension_semantics<parallel>], iteration_bounds = array<i64: 1>, scalar_prefetch = 0 : i64, scratch_operands = 0 : i64, tpu.core_type = #tpu.core_type<tc>, window_params = [{transform_indices = @transform_0, window_bounds = array<i64: 8, 256>}, {transform_indices = @transform_1, window_bounds = array<i64: 8, 256>}]} {
    %c0 = arith.constant 0 : index
    %c0_0 = arith.constant 0 : index
    %0 = vector.load %arg1[%c0, %c0_0] : memref<8x256xf32, #tpu.memory_space<vmem>>, vector<8x256xf32>
    %c0_1 = arith.constant 0 : index
    %c0_2 = arith.constant 0 : index
    %1 = vector.load %arg2[%c0_1, %c0_2] : memref<8x256xf32, #tpu.memory_space<vmem>>, vector<8x256xf32>
    tpu.vector_store %arg2[%c0_1, %c0_2], %0 {strides = array<i32>} : memref<8x256xf32, #tpu.memory_space<vmem>>, vector<8x256xf32>,
    return
  }
  func.func @transform_0(%arg0: i32) -> (i32, i32) {
    %c0_i32 = arith.constant 0 : i32
    %c0_i32_0 = arith.constant 0 : i32
    return %arg0, %c0_i32 : i32, i32
  }
  func.func @transform_1(%arg0: i32) -> (i32, i32) {
    %c0_i32 = arith.constant 0 : i32
    %c0_i32_0 = arith.constant 0 : i32
    return %arg0, %c0_i32 : i32, i32
  }
}

</mosaic_0001>

<bundles_post_ra>
// kernel: tpu_custom_call.1
= control target key start
LH: loop header
LB: loop body
LE: loop exit
PB: predicated region body
PF: predicated region fallthrough
CT: control target
= control target key end

     0   :  { %6 = vsyncpa [#allocation3], 0  ;;  %s126_s0 = inlined_call_operand.hbm [shape: f32[8,256], index: 0, kind: input, shape index: {}]   ;;  %s127_s1 = inlined_call_operand.hbm [shape: f32[8,256], index: 1, kind: output, shape index: {}]  }
   0x1   :  { %7 = vsyncpa [#allocation4], 0  ;;  %s90_s6 = smov [#allocation2]   ;;  %s42_s10 = scalar_lea.hbm %s126_s0, 256 }
   0x2   :  { %s14_s7 = sshll.u32 %s90_s6, 4  ;;  %p43_p0 = scmp.ne.s32.totalorder %s126_s0, %s42_s10  ;;  %s15_s7 = int_to_ptr.vmem [resolvable:$true] %s14_s7 }
   0x3   :  { %p46_p1 = scmp.lt.u32.totalorder %s42_s10, %s126_s0 }
   0x5   :  { %p48_p2 = pnand %p46_p1, %p43_p0 }
   0x7   :  { %51 = shalt.err (!%p48_p2)
}
   0x8   :  { %s52_s15 = scalar_lea.vmem %s15_s7, 256  ;;  %p57_p4 = scmp.lt.s32.totalorder %s15_s7, %s15_s7 }
   0x9   :  { %p53_p3 = scmp.ne.s32.totalorder %s15_s7, %s52_s15  ;;  %p58_p5 = scmp.lt.s32.totalorder %s52_s15, %s52_s15 }
   0xb   :  { %p59_p6 = por %p58_p5, %p57_p4 }
   0xd   :  { %p60_p7 = pnand %p59_p6, %p53_p3 }
   0xf   :  { %63 = shalt.err (!%p60_p7)
}
  0x10   :  { %17 = dma.hbm_to_vmem [thread:$0]  %s126_s0, 256, %s15_s7, [#allocation3]  }
  0x11   :  { %86 = dma.done.wait [#allocation3], 256  }
  0x12   :  { %87 = vsyncadd [#allocation3], 4294967040  ;;  %s91_s18 = smov [#allocation5]   ;;  %v21_v0 = vld [vmem:[#allocation2] sm:$0xff]  ;;  %v22_v1 = vld [vmem:[#allocation2 + $0x8] sm:$0xff] }
  0x13   :  { %s31_s19 = sshll.u32 %s91_s18, 4  ;;  %23 = vst [vmem:[#allocation5] sm:$0xff] %v21_v0  ;;  %24 = vst [vmem:[#allocation5 + $0x8] sm:$0xff] %v22_v1  ;;  %s32_s19 = int_to_ptr.vmem [resolvable:$true] %s31_s19 }
  0x14   :  { %s64_s20 = scalar_lea.vmem %s32_s19, 256  ;;  %p69_p9 = scmp.lt.s32.totalorder %s32_s19, %s32_s19 }
  0x15   :  { %p65_p8 = scmp.ne.s32.totalorder %s32_s19, %s64_s20  ;;  %p70_p10 = scmp.lt.s32.totalorder %s64_s20, %s64_s20 }
  0x17   :  { %p71_p11 = por %p70_p10, %p69_p9 }
  0x19   :  { %p72_p12 = pnand %p71_p11, %p65_p8 }
  0x1b   :  { %75 = shalt.err (!%p72_p12)
}
  0x1c   :  { %s76_s0 = scalar_lea.hbm %s127_s1, 256 }
  0x1d   :  { %p77_p13 = scmp.ne.s32.totalorder %s127_s1, %s76_s0  ;;  %p80_p0 = scmp.lt.u32.totalorder %s76_s0, %s127_s1 }
  0x1f   :  { %p82_p1 = pnand %p80_p0, %p77_p13 }
  0x21   :  { %85 = shalt.err (!%p82_p1)
}
  0x22   :  { %34 = dma.vmem_to_hbm [thread:$0]  %s32_s19, 256, %s127_s1, [#allocation4]  }
  0x23   :  { %88 = dma.done.wait [#allocation4], 256  }
  0x24   :  { %89 = vsyncadd [#allocation4], 4294967040 }
  0x25   :  { %38 = vsyncpa [#allocation3], 1 }
  0x26   :  { %39 = vsyncpa [#allocation4], 1 }

</bundles_post_ra>
